<compile_context>
chip_gen: v7x
topology: tpu7x:2x2x1
jax: 0.10.0
libtpu: 0.0.40
codegen_flags: <defaults>
</compile_context>

<pallas_src>
from functools import partial

import jax
import jax.numpy as jnp
from jax.experimental import pallas as pl
from jax.experimental.pallas import tpu as pltpu

BN_EPS = 1e-5


def _round_up(v, m):
    return ((v + m - 1) // m) * m


def _stats_kernel(x_ref, w_ref, gamma_ref, beta_ref, scale_ref, bias_ref,
                  sum_ref, ssq_ref, *, inv_count):
    # x_ref: (tm, Cin) bf16 tile of strided/flattened pixels
    # w_ref: (Cin, Cout_p) bf16 1x1-conv weight (transposed)
    # gamma_ref, beta_ref: (1, Cout_p) f32 BN affine params
    # scale_ref, bias_ref: (1, Cout_p) f32 outputs (written at last step only)
    # sum_ref, ssq_ref: (1, Cout_p) f32 VMEM accumulators (persist across grid)
    i = pl.program_id(0)

    @pl.when(i == 0)
    def _():
        sum_ref[...] = jnp.zeros_like(sum_ref)
        ssq_ref[...] = jnp.zeros_like(ssq_ref)

    # 1x1 conv == channel matmul on the MXU; f32 accumulation.
    y = jnp.dot(x_ref[...], w_ref[...], preferred_element_type=jnp.float32)
    sum_ref[...] += jnp.sum(y, axis=0, keepdims=True)
    ssq_ref[...] += jnp.sum(y * y, axis=0, keepdims=True)

    @pl.when(i == pl.num_programs(0) - 1)
    def _():
        mean = sum_ref[...] * inv_count
        # f32 accumulators; clamp guards tiny negative values from cancellation.
        var = jnp.maximum(ssq_ref[...] * inv_count - mean * mean, 0.0)
        inv_std = jax.lax.rsqrt(var + BN_EPS)
        scale = gamma_ref[...] * inv_std
        scale_ref[...] = scale
        bias_ref[...] = beta_ref[...] - mean * scale


def _normalize_kernel(x_ref, w_ref, scale_ref, bias_ref, o_ref):
    # Recompute the cheap matmul and apply the folded BN as one FMA-shaped op.
    y = jnp.dot(x_ref[...], w_ref[...], preferred_element_type=jnp.float32)
    o_ref[...] = (y * scale_ref[...] + bias_ref[...]).astype(o_ref.dtype)


def downsample_forward(x_nchw, conv_w, bn_gamma, bn_beta, stride=1, tm=512):
    """x_nchw: (N, Cin, H, W); conv_w: (Cout, Cin, 1, 1); returns (N, Cout, Ho, Wo)."""
    n, cin, h, w = x_nchw.shape
    cout = conv_w.shape[0]

    # --- glue: stride subsample + NCHW -> (M, Cin) channels-last.  The slice /
    # transpose / bf16 cast / pad fuse into one XLA producer fusion. ---
    xs = x_nchw[:, :, ::stride, ::stride]                  # (N, Cin, Ho, Wo)
    ho, wo = xs.shape[2], xs.shape[3]
    m = n * ho * wo

    tm = min(tm, _round_up(m, 8))                          # tile rows (mult of 8)
    m_pad = _round_up(m, tm)                               # zero-padded row count
    cout_p = _round_up(cout, 128)                          # lane-dense output width

    x2d = jnp.transpose(xs, (0, 2, 3, 1)).reshape(m, cin).astype(jnp.bfloat16)
    x2d = jnp.pad(x2d, ((0, m_pad - m), (0, 0)))           # zero rows: stats-neutral

    w2d = jnp.pad(conv_w.reshape(cout, cin).T.astype(jnp.bfloat16),
                  ((0, 0), (0, cout_p - cout)))            # (Cin, Cout_p)
    gamma2d = jnp.pad(bn_gamma.astype(jnp.float32).reshape(1, cout),
                      ((0, 0), (0, cout_p - cout)))
    beta2d = jnp.pad(bn_beta.astype(jnp.float32).reshape(1, cout),
                     ((0, 0), (0, cout_p - cout)))

    grid = (m_pad // tm,)

    # Explicit VMEM budget (double-buffered x + y tiles, resident weight,
    # small per-channel vectors) with headroom; safe on v7x's 64 MiB.
    need = (2 * tm * cin * 2            # x tiles, bf16, double-buffered
            + 2 * tm * cout_p * 4       # y tiles, f32, double-buffered
            + cin * cout_p * 2          # weight, bf16
            + 16 * cout_p * 4)          # scale/bias/accumulators
    vmem_limit = min(max(int(1.5 * need) + (4 << 20), 16 << 20), 48 << 20)

    x_spec = pl.BlockSpec((tm, cin), lambda i: (i, 0))
    w_spec = pl.BlockSpec((cin, cout_p), lambda i: (0, 0))
    vec_spec = pl.BlockSpec((1, cout_p), lambda i: (0, 0))

    # ---- pass 1: per-channel batch statistics -> folded scale/bias ----
    scale, bias = pl.pallas_call(
        partial(_stats_kernel, inv_count=1.0 / float(m)),
        out_shape=(jax.ShapeDtypeStruct((1, cout_p), jnp.float32),
                   jax.ShapeDtypeStruct((1, cout_p), jnp.float32)),
        grid=grid,
        in_specs=[x_spec, w_spec, vec_spec, vec_spec],
        out_specs=(vec_spec, vec_spec),
        scratch_shapes=[pltpu.VMEM((1, cout_p), jnp.float32),
                        pltpu.VMEM((1, cout_p), jnp.float32)],
        compiler_params=pltpu.CompilerParams(
            dimension_semantics=("arbitrary",),   # cross-tile reduction
            vmem_limit_bytes=vmem_limit),
    )(x2d, w2d, gamma2d, beta2d)

    # ---- pass 2: re-stream x, matmul, apply y*scale + bias ----
    out2d = pl.pallas_call(
        _normalize_kernel,
        out_shape=jax.ShapeDtypeStruct((m_pad, cout_p), jnp.float32),
        grid=grid,
        in_specs=[x_spec, w_spec, vec_spec, vec_spec],
        out_specs=pl.BlockSpec((tm, cout_p), lambda i: (i, 0)),
        compiler_params=pltpu.CompilerParams(
            dimension_semantics=("parallel",),    # independent tiles (2 TCs on v7x)
            vmem_limit_bytes=vmem_limit),
    )(x2d, w2d, scale, bias)

    # --- glue: drop padding, back to NCHW. ---
    out = out2d[:m, :cout].reshape(n, ho, wo, cout)
    return jnp.transpose(out, (0, 3, 1, 2))


def _reference(x_nchw, conv_w, bn_gamma, bn_beta, stride):
    # Matches the kernel's numerics: bf16-quantized matmul operands, f32 math.
    xs = x_nchw[:, :, ::stride, ::stride]
    xq = xs.astype(jnp.bfloat16).astype(jnp.float32)
    wq = conv_w.reshape(conv_w.shape[0], -1).astype(jnp.bfloat16).astype(jnp.float32)
    y = jnp.einsum("nchw,oc->nohw", xq, wq)
    mean = jnp.mean(y, axis=(0, 2, 3), keepdims=True)
    var = jnp.mean((y - mean) ** 2, axis=(0, 2, 3), keepdims=True)
    yhat = (y - mean) * jax.lax.rsqrt(var + BN_EPS)
    return yhat * bn_gamma.reshape(1, -1, 1, 1) + bn_beta.reshape(1, -1, 1, 1)


if __name__ == "__main__":
    key = jax.random.PRNGKey(0)
    kx, kw = jax.random.split(key)

    N, CIN, COUT, H, W, STRIDE = 2, 4, 8, 16, 16, 2

    x = jax.random.normal(kx, (N, CIN, H, W), dtype=jnp.float32)
    # Conv2d(in, out, 1, stride, bias=False) weight: (COUT, CIN, 1, 1)
    conv_w = jax.random.normal(kw, (COUT, CIN, 1, 1), dtype=jnp.float32) * 0.1
    # BatchNorm2d defaults: weight=1, bias=0
    bn_gamma = jnp.ones((COUT,), dtype=jnp.float32)
    bn_beta = jnp.zeros((COUT,), dtype=jnp.float32)

    # tm=48 keeps the toy problem multi-tile (grid=3) and exercises both the
    # cross-tile statistics accumulation and the M zero-padding path;
    # production shapes use the default tm=512.
    out = downsample_forward(x, conv_w, bn_gamma, bn_beta, stride=STRIDE, tm=48)
    out = jax.block_until_ready(out)

    ref = _reference(x, conv_w, bn_gamma, bn_beta, STRIDE)
    assert out.shape == (N, COUT, H // STRIDE, W // STRIDE)
    assert jnp.allclose(out, ref, atol=2e-3, rtol=2e-3), float(
        jnp.max(jnp.abs(out - ref)))

    print("KERNEL_OK")
</pallas_src>

<mosaic_0001>
module attributes {stable_mosaic.version = 11 : i64} {
  func.func @_stats_kernel(%arg0: i32, %arg1: memref<48x4xbf16, #tpu.memory_space<vmem>>, %arg2: memref<4x128xbf16, #tpu.memory_space<vmem>>, %arg3: memref<1x128xf32, #tpu.memory_space<vmem>>, %arg4: memref<1x128xf32, #tpu.memory_space<vmem>>, %arg5: memref<1x128xf32, #tpu.memory_space<vmem>>, %arg6: memref<1x128xf32, #tpu.memory_space<vmem>>, %arg7: memref<1x128xf32, #tpu.memory_space<vmem>>, %arg8: memref<1x128xf32, #tpu.memory_space<vmem>>) attributes {dimension_semantics = [#tpu.dimension_semantics<arbitrary>], iteration_bounds = array<i64: 3>, scalar_prefetch = 0 : i64, scratch_operands = 2 : i64, tpu.core_type = #tpu.core_type<tc>, window_params = [{transform_indices = @transform_0, window_bounds = array<i64: 48, 4>}, {pipeline_mode = #tpu.pipeline_mode<synchronous>, transform_indices = @transform_1, window_bounds = array<i64: 4, 128>}, {pipeline_mode = #tpu.pipeline_mode<synchronous>, transform_indices = @transform_2, window_bounds = array<i64: 1, 128>}, {pipeline_mode = #tpu.pipeline_mode<synchronous>, transform_indices = @transform_3, window_bounds = array<i64: 1, 128>}, {pipeline_mode = #tpu.pipeline_mode<synchronous>, transform_indices = @transform_4, window_bounds = array<i64: 1, 128>}, {pipeline_mode = #tpu.pipeline_mode<synchronous>, transform_indices = @transform_5, window_bounds = array<i64: 1, 128>}]} {
    %c0_i32 = arith.constant 0 : i32
    %0 = arith.cmpi eq, %arg0, %c0_i32 : i32
    %1 = arith.extui %0 : i1 to i32
    %c0_i32_0 = arith.constant 0 : i32
    %2 = arith.cmpi ne, %1, %c0_i32_0 : i32
    scf.if %2 {
      %cst_15 = arith.constant 0.000000e+00 : f32
      %20 = vector.broadcast %cst_15 : f32 to vector<1x128xf32>
      %c0_16 = arith.constant 0 : index
      %c0_17 = arith.constant 0 : index
      %21 = vector.load %arg7[%c0_16, %c0_17] : memref<1x128xf32, #tpu.memory_space<vmem>>, vector<1x128xf32>
      tpu.vector_store %arg7[%c0_16, %c0_17], %20 {strides = array<i32>} : memref<1x128xf32, #tpu.memory_space<vmem>>, vector<1x128xf32>,
      %cst_18 = arith.constant 0.000000e+00 : f32
      %22 = vector.broadcast %cst_18 : f32 to vector<1x128xf32>
      %c0_19 = arith.constant 0 : index
      %c0_20 = arith.constant 0 : index
      %23 = vector.load %arg8[%c0_19, %c0_20] : memref<1x128xf32, #tpu.memory_space<vmem>>, vector<1x128xf32>
      tpu.vector_store %arg8[%c0_19, %c0_20], %22 {strides = array<i32>} : memref<1x128xf32, #tpu.memory_space<vmem>>, vector<1x128xf32>,
    } else {
    }
    %c0 = arith.constant 0 : index
    %c0_1 = arith.constant 0 : index
    %3 = vector.load %arg1[%c0, %c0_1] : memref<48x4xbf16, #tpu.memory_space<vmem>>, vector<48x4xbf16>
    %c0_2 = arith.constant 0 : index
    %c0_3 = arith.constant 0 : index
    %4 = vector.load %arg2[%c0_2, %c0_3] : memref<4x128xbf16, #tpu.memory_space<vmem>>, vector<4x128xbf16>
    %cst = arith.constant dense<0.000000e+00> : vector<48x128xf32>
    %5 = tpu.matmul %3, %4, %cst {dimension_numbers = #tpu.dot_dimension_numbers<[1], [0], [0], [1], [0, 0, 1, 1], [], []>} : vector<48x4xbf16>, vector<4x128xbf16>, vector<48x128xf32> -> vector<48x128xf32>
    %c0_4 = arith.constant 0 : index
    %c0_5 = arith.constant 0 : index
    %6 = vector.load %arg7[%c0_4, %c0_5] : memref<1x128xf32, #tpu.memory_space<vmem>>, vector<1x128xf32>
    %cst_6 = arith.constant dense<0.000000e+00> : vector<128xf32>
    %7 = vector.multi_reduction <add>, %5, %cst_6 [0] : vector<48x128xf32> to vector<128xf32>
    %8 = vector.shape_cast %7 : vector<128xf32> to vector<1x128xf32>
    %9 = arith.addf %6, %8 : vector<1x128xf32>
    %c0_7 = arith.constant 0 : index
    %c0_8 = arith.constant 0 : index
    %10 = vector.load %arg7[%c0_7, %c0_8] : memref<1x128xf32, #tpu.memory_space<vmem>>, vector<1x128xf32>
    tpu.vector_store %arg7[%c0_7, %c0_8], %9 {strides = array<i32>} : memref<1x128xf32, #tpu.memory_space<vmem>>, vector<1x128xf32>,
    %c0_9 = arith.constant 0 : index
    %c0_10 = arith.constant 0 : index
    %11 = vector.load %arg8[%c0_9, %c0_10] : memref<1x128xf32, #tpu.memory_space<vmem>>, vector<1x128xf32>
    %12 = arith.mulf %5, %5 : vector<48x128xf32>
    %cst_11 = arith.constant dense<0.000000e+00> : vector<128xf32>
    %13 = vector.multi_reduction <add>, %12, %cst_11 [0] : vector<48x128xf32> to vector<128xf32>
    %14 = vector.shape_cast %13 : vector<128xf32> to vector<1x128xf32>
    %15 = arith.addf %11, %14 : vector<1x128xf32>
    %c0_12 = arith.constant 0 : index
    %c0_13 = arith.constant 0 : index
    %16 = vector.load %arg8[%c0_12, %c0_13] : memref<1x128xf32, #tpu.memory_space<vmem>>, vector<1x128xf32>
    tpu.vector_store %arg8[%c0_12, %c0_13], %15 {strides = array<i32>} : memref<1x128xf32, #tpu.memory_space<vmem>>, vector<1x128xf32>,
    %c2_i32 = arith.constant 2 : i32
    %17 = arith.cmpi eq, %arg0, %c2_i32 : i32
    %18 = arith.extui %17 : i1 to i32
    %c0_i32_14 = arith.constant 0 : i32
    %19 = arith.cmpi ne, %18, %c0_i32_14 : i32
    scf.if %19 {
      %c0_15 = arith.constant 0 : index
      %c0_16 = arith.constant 0 : index
      %20 = vector.load %arg7[%c0_15, %c0_16] : memref<1x128xf32, #tpu.memory_space<vmem>>, vector<1x128xf32>
      %cst_17 = arith.constant 7.812500e-03 : f32
      %21 = vector.broadcast %cst_17 : f32 to vector<1x128xf32>
      %22 = arith.mulf %20, %21 : vector<1x128xf32>
      %c0_18 = arith.constant 0 : index
      %c0_19 = arith.constant 0 : index
      %23 = vector.load %arg8[%c0_18, %c0_19] : memref<1x128xf32, #tpu.memory_space<vmem>>, vector<1x128xf32>
      %cst_20 = arith.constant 7.812500e-03 : f32
      %24 = vector.broadcast %cst_20 : f32 to vector<1x128xf32>
      %25 = arith.mulf %23, %24 : vector<1x128xf32>
      %26 = arith.mulf %22, %22 : vector<1x128xf32>
      %27 = arith.subf %25, %26 : vector<1x128xf32>
      %cst_21 = arith.constant 0.000000e+00 : f32
      %28 = vector.broadcast %cst_21 : f32 to vector<1x128xf32>
      %29 = arith.maximumf %27, %28 : vector<1x128xf32>
      %cst_22 = arith.constant 9.99999974E-6 : f32
      %30 = vector.broadcast %cst_22 : f32 to vector<1x128xf32>
      %31 = arith.addf %29, %30 : vector<1x128xf32>
      %32 = math.rsqrt %31 : vector<1x128xf32>
      %c0_23 = arith.constant 0 : index
      %c0_24 = arith.constant 0 : index
      %33 = vector.load %arg3[%c0_23, %c0_24] : memref<1x128xf32, #tpu.memory_space<vmem>>, vector<1x128xf32>
      %34 = arith.mulf %33, %32 : vector<1x128xf32>
      %c0_25 = arith.constant 0 : index
      %c0_26 = arith.constant 0 : index
      %35 = vector.load %arg5[%c0_25, %c0_26] : memref<1x128xf32, #tpu.memory_space<vmem>>, vector<1x128xf32>
      tpu.vector_store %arg5[%c0_25, %c0_26], %34 {strides = array<i32>} : memref<1x128xf32, #tpu.memory_space<vmem>>, vector<1x128xf32>,
      %c0_27 = arith.constant 0 : index
      %c0_28 = arith.constant 0 : index
      %36 = vector.load %arg4[%c0_27, %c0_28] : memref<1x128xf32, #tpu.memory_space<vmem>>, vector<1x128xf32>
      %37 = arith.mulf %22, %34 : vector<1x128xf32>
      %38 = arith.subf %36, %37 : vector<1x128xf32>
      %c0_29 = arith.constant 0 : index
      %c0_30 = arith.constant 0 : index
      %39 = vector.load %arg6[%c0_29, %c0_30] : memref<1x128xf32, #tpu.memory_space<vmem>>, vector<1x128xf32>
      tpu.vector_store %arg6[%c0_29, %c0_30], %38 {strides = array<i32>} : memref<1x128xf32, #tpu.memory_space<vmem>>, vector<1x128xf32>,
    } else {
    }
    return
  }
  func.func @transform_0(%arg0: i32) -> (i32, i32) {
    %c0_i32 = arith.constant 0 : i32
    %c0_i32_0 = arith.constant 0 : i32
    return %arg0, %c0_i32 : i32, i32
  }
  func.func @transform_1(%arg0: i32) -> (i32, i32) {
    %c0_i32 = arith.constant 0 : i32
    %c0_i32_0 = arith.constant 0 : i32
    %c0_i32_1 = arith.constant 0 : i32
    return %c0_i32, %c0_i32_0 : i32, i32
  }
  func.func @transform_2(%arg0: i32) -> (i32, i32) {
    %c0_i32 = arith.constant 0 : i32
    %c0_i32_0 = arith.constant 0 : i32
    %c0_i32_1 = arith.constant 0 : i32
    return %c0_i32, %c0_i32_0 : i32, i32
  }
  func.func @transform_3(%arg0: i32) -> (i32, i32) {
    %c0_i32 = arith.constant 0 : i32
    %c0_i32_0 = arith.constant 0 : i32
    %c0_i32_1 = arith.constant 0 : i32
    return %c0_i32, %c0_i32_0 : i32, i32
  }
  func.func @transform_4(%arg0: i32) -> (i32, i32) {
    %c0_i32 = arith.constant 0 : i32
    %c0_i32_0 = arith.constant 0 : i32
    %c0_i32_1 = arith.constant 0 : i32
    return %c0_i32, %c0_i32_0 : i32, i32
  }
  func.func @transform_5(%arg0: i32) -> (i32, i32) {
    %c0_i32 = arith.constant 0 : i32
    %c0_i32_0 = arith.constant 0 : i32
    %c0_i32_1 = arith.constant 0 : i32
    return %c0_i32, %c0_i32_0 : i32, i32
  }
}

</mosaic_0001>

<bundles_post_ra>
// kernel: tpu_custom_call.1
= control target key start
LH: loop header
LB: loop body
LE: loop exit
PB: predicated region body
PF: predicated region fallthrough
CT: control target
= control target key end

     0   :  { %11 = vsyncpa [#allocation5], 0  ;;  %s679_s0 = inlined_call_operand.vmem [shape: bf16[144,4], index: 0, kind: input, shape index: {}]   ;;  %s680_s1 = inlined_call_operand.vmem [shape: bf16[4,128], index: 1, kind: input, shape index: {}]   ;;  %s681_s2 = inlined_call_operand.vmem [shape: f32[1,128], index: 2, kind: input, shape index: {}]   ;;  %s682_s3 = inlined_call_operand.vmem [shape: f32[1,128], index: 3, kind: input, shape index: {}]   ;;  %s683_s4 = inlined_call_operand.hbm [shape: f32[1,128], index: 4, kind: output, shape index: {0}]   ;;  %s684_s5 = inlined_call_operand.hbm [shape: f32[1,128], index: 5, kind: output, shape index: {1}]  }
   0x1   :  { %12 = vsyncpa [#allocation7], 0  ;;  %s606_s18 = smov 0  }
   0x2 LB: > { %s612_s19 = sadd.s32 4294967295, %s569_s18   ;;  %p437_p0 = scmp.ge.s32.totalorder %s569_s18, 1  ;;  %s569_s18 = sphi %s606_s18, %s18_s18  }
   0x3   : > { %p183_p1 = scmp.lt.s32.totalorder %s569_s18, 4 }
   0x5   : > { %p184_p2 = pnand %p437_p0, %p183_p1 }
   0x6   : > { %s206_s20 = smul.u32 (!%p184_p2), 6, %s612_s19  ;;  %p439_p4 = scmp.ne.s32.totalorder (!%p184_p2), %s612_s19, 0 }
   0x7   : > { %187 = sbr.rel (%p184_p2) target bundleno = 348 (0x15c), region = 36 }
   0x8   : > { %p207_p3 = scmp.lt.s32.totalorder (!%p184_p2), %s206_s20, 17 }
   0xe   : > { %s686_s20 = smov (!%p207_p3, %s206_s20), 17  ;;  %216 = sbr.rel (%p439_p4) target bundleno = 21 (0x15), region = 40 }
   0xf   : > { %s438_s21 = sshll.u32 %s686_s20, 2  ;;  %v571_v0 = vmov (!%p439_p4), 0.0  }
  0x10   : > { %s210_s24 = scalar_lea.vmem %s679_s0, %s438_s21  ;;  %217 = vst [vmem:[#allocation2] sm:$0x1] (!%p439_p4), %v571_v0  ;;  %218 = vst [vmem:[#allocation3] sm:$0x1] (!%p439_p4), %v571_v0 }
  0x15 PF: > { %v225_v1 = vld [vmem:[%s680_s1] sm:$0x3]  ;;  %vm251_vm0 = vcmask 1041408   ;;  %v572_v2 = vmov 0.0   ;;  %vm241_vm1 = vcmask 31744   ;;  %v499_v5 = vld [vmem:[%s210_s24 + $0x8] sm:$0xff]  }
  0x16   : > { %457 = vmatprep.subr.bf16.mxu0 %v572_v2  ;;  %471 = vmatprep.subr.bf16.mxu1 %v572_v2  ;;  %v253_v3 = vsel %vm251_vm0, %v225_v1, 0  ;;  %v498_v4 = vld [vmem:[%s210_s24] sm:$0xff]   ;;  %vm573_vm2 = vmmov 0   ;;  %v500_v6 = vld [vmem:[%s210_s24 + $0x10] sm:$0xff]   ;;  %p446_p5 = scmp.ne.s32.totalorder %s612_s19, 2 }
  0x17   : > { %458 = vmatpush3.bf16.msra.mxu0 %v253_v3  ;;  %472 = vmatpush3.bf16.msra.mxu1 %v253_v3  ;;  %v312_v44 = vld [vmem:[#allocation2] sm:$0x1]  ;;  %v326_v47 = vld [vmem:[#allocation3] sm:$0x1]  ;;  %v359_v59 = vld [vmem:[%s681_s2] sm:$0x1] (!%p446_p5) }
  0x18   : > { %459 = vmatprep.mubr.msk.bf16.mxu0 %vm573_vm2, %v572_v2  ;;  %463 = vmatprep.mubr.msk.bf16.mxu1 %vm573_vm2, %v572_v2  ;;  %v362_v62 = vld [vmem:[%s682_s3] sm:$0x1] (!%p446_p5) }
  0x1a   : > { %460 = vmatmul.mubr.msk.bf16.vlgmr.msra.gmra.mrb[0].mxu0 %vm241_vm1, %v498_v4  ;;  %464 = vmatmul.mubr.msk.bf16.vlgmr.msra.gmra.mrb[0].mxu1 %vm241_vm1, %v499_v5 }
  0x1b   : > { %467 = vmatprep.mubr.msk.bf16.mxu1 %vm573_vm2, %v572_v2 }
  0x22   : > { %468 = vmatmul.mubr.msk.bf16.gmra.mrb[4].mxu1 %vm241_vm1, %v500_v6 }
  0xed   : > { %v289_v7 = vpop.f32.mrb[0].mxu0  ;;  %v297_v8 = vpop.f32.mrb[0].mxu1 }
  0xee   : > { %v461_v9 = vpop.f32.mrb[1].mxu0  ;;  %v465_v10 = vpop.f32.mrb[1].mxu1  ;;  %v327_v13 = vmul.f32 %v289_v7, %v289_v7  ;;  %v329_v18 = vmul.f32 %v297_v8, %v297_v8 }
  0xef   : > { %v292_v11 = vpop.f32.mrb[2].mxu0  ;;  %v300_v12 = vpop.f32.mrb[2].mxu1 }
  0xf0   : > { %v313_v14 = vadd.f32 %v292_v11, %v289_v7  ;;  %v328_v15 = vmul.f32 %v292_v11, %v292_v11  ;;  %v462_v16 = vpop.f32.mrb[3].mxu0  ;;  %v466_v17 = vpop.f32.mrb[3].mxu1  ;;  %v330_v22 = vmul.f32 %v300_v12, %v300_v12 }
  0xf2   : > { %v333_v19 = vadd.f32 %v328_v15, %v327_v13  ;;  %v314_v20 = vadd.f32 %v313_v14, %v297_v8 }
  0xf4   : > { %v315_v21 = vadd.f32 %v314_v20, %v300_v12  ;;  %v334_v23 = vadd.f32 %v333_v19, %v329_v18 }
  0xf5   : > { %v305_v24 = vpop.f32.mrb[4].mxu1 }
  0xf6   : > { %v335_v25 = vadd.f32 %v334_v23, %v330_v22  ;;  %v316_v26 = vadd.f32 %v315_v21, %v305_v24  ;;  %v331_v27 = vmul.f32 %v305_v24, %v305_v24  ;;  %v469_v28 = vpop.f32.mrb[5].mxu1 }
  0xf7   : > { %v308_v29 = vpop.f32.mrb[6].mxu1 }
  0xf8   : > { %v336_v30 = vadd.f32 %v335_v25, %v331_v27  ;;  %v317_v31 = vadd.f32 %v316_v26, %v308_v29  ;;  %v332_v32 = vmul.f32 %v308_v29, %v308_v29  ;;  %v470_v33 = vpop.f32.mrb[7].mxu1 }
  0xfa   : > { %v318_v34 = vrot.slane %v317_v31, 4  ;;  %v337_v35 = vadd.f32 %v336_v30, %v332_v32 }
  0xfc   : > { %v319_v36 = vadd.f32 %v318_v34, %v317_v31  ;;  %v338_v37 = vrot.slane %v337_v35, 4 }
  0xfe   : > { %v320_v38 = vrot.slane %v319_v36, 2  ;;  %v339_v39 = vadd.f32 %v338_v37, %v337_v35 }
 0x100   : > { %v321_v40 = vadd.f32 %v320_v38, %v319_v36  ;;  %v340_v41 = vrot.slane %v339_v39, 2 }
 0x102   : > { %v322_v42 = vrot.slane %v321_v40, 1  ;;  %v341_v43 = vadd.f32 %v340_v41, %v339_v39 }
 0x104   : > { %v323_v45 = vadd.f32 %v322_v42, %v321_v40  ;;  %v342_v46 = vrot.slane %v341_v43, 1  ;;  %349 = sbr.rel (%p446_p5) target bundleno = 300 (0x12c), region = 44 }
 0x106   : > { %v324_v48 = vadd.f32 %v323_v45, %v312_v44  ;;  %v343_v49 = vadd.f32 %v342_v46, %v341_v43 }
 0x108   : > { %325 = vst [vmem:[#allocation2] sm:$0x1] %v324_v48  ;;  %v344_v50 = vadd.f32 %v343_v49, %v326_v47 }
 0x10a   : > { %345 = vst [vmem:[#allocation3] sm:$0x1] %v344_v50 }
 0x10f   : > { %v350_v51 = vld [vmem:[#allocation2] sm:$0x1] }
 0x110   : > { %v351_v53 = vmul.f32 0.0078125, %v350_v51 }
 0x111   : > { %v352_v52 = vld [vmem:[#allocation3] sm:$0x1] }
 0x112   : > { %v353_v54 = vmul.f32 0.0078125, %v352_v52  ;;  %v354_v55 = vmul.f32 %v351_v53, %v351_v53 }
 0x114   : > { %v355_v56 = vsub.f32 %v353_v54, %v354_v55 }
 0x116   : > { %v356_v57 = vmax.f32 %v355_v56, 0.0 }
 0x118   : > { %v357_v58 = vadd.f32 1e-05, %v356_v57 }
 0x11a   : > { %501 = vrsqrt.f32 %v357_v58 }
 0x124   : > { %v502_v60 = vpop.eup %501 }
 0x125   : > { %v360_v61 = vmul.f32 %v502_v60, %v359_v59 }
 0x127   : > { %361 = vst [vmem:[#allocation4] sm:$0x1] %v360_v61  ;;  %v363_v63 = vmul.f32 %v360_v61, %v351_v53 }
 0x129   : > { %v364_v0 = vsub.f32 %v362_v62, %v363_v63 }
 0x12b   : > { %365 = vst [vmem:[#allocation6] sm:$0x1] %v364_v0 }
 0x12c PF: > { %p481_p6 = scmp.eq.s32.totalorder %s612_s19, 2  ;;  %s574_s6 = smov [#allocation4]  }
 0x12d   : > { %s373_s7 = sshll.u32 %s574_s6, 4  ;;  %s575_s8 = smov [#allocation6]   ;;  %s374_s7 = int_to_ptr.vmem [resolvable:$true] %s373_s7 }
 0x12e   : > { %s384_s9 = sshll.u32 %s575_s8, 4  ;;  %s503_s10 = scalar_lea.vmem %s374_s7, 16  ;;  %s385_s9 = int_to_ptr.vmem [resolvable:$true] %s384_s9 }
 0x12f   : > { %p504_p7 = scmp.ne.s32.totalorder %s374_s7, %s503_s10  ;;  %s509_s11 = scalar_lea.vmem %s374_s7, 32 }
 0x130   : > { %p510_p10 = scmp.lt.s32.totalorder %s374_s7, %s374_s7  ;;  %p511_p11 = scmp.lt.s32.totalorder %s509_s11, %s503_s10 }
 0x131   : > { %p505_p8 = pnand %p504_p7, %p481_p6 }
 0x132   : > { %p512_p12 = por %p511_p11, %p510_p10 }
 0x133   : > { %p506_p9 = pneg %p505_p8 }
 0x135   : > { %p513_p13 = pnand %p512_p12, %p506_p9 }
 0x137   : > { %516 = shalt.err (!%p513_p13)
}
 0x138   : > { %s517_s14 = scalar_lea.hbm %s683_s4, 16 }
 0x139   : > { %p518_p0 = scmp.ne.s32.totalorder %s683_s4, %s517_s14  ;;  %p523_p3 = scmp.lt.u32.totalorder %s517_s14, %s683_s4 }
 0x13b   : > { %p519_p1 = pnand %p518_p0, %p481_p6 }
 0x13d   : > { %p520_p2 = pneg %p519_p1 }
 0x13f   : > { %p525_p4 = pnand %p523_p3, %p520_p2 }
 0x141   : > { %528 = shalt.err (!%p525_p4)
}
 0x142   : > { %474 = dma.vmem_to_hbm [thread:$0]  (%p481_p6), %s374_s7, 16, %s683_s4, [#allocation5]  }
 0x143   : > { %s529_s23 = scalar_lea.vmem %s385_s9, 16  ;;  %s535_s24 = scalar_lea.vmem %s385_s9, 32 }
 0x144   : > { %p530_p5 = scmp.ne.s32.totalorder %s385_s9, %s529_s23  ;;  %p536_p9 = scmp.lt.s32.totalorder %s385_s9, %s385_s9 }
 0x145   : > { %p537_p10 = scmp.lt.s32.totalorder %s535_s24, %s529_s23 }
 0x146   : > { %p531_p7 = pnand %p530_p5, %p481_p6 }
 0x147   : > { %p538_p11 = por %p537_p10, %p536_p9 }
 0x148   : > { %p532_p8 = pneg %p531_p7 }
 0x14a   : > { %p539_p12 = pnand %p538_p11, %p532_p8 }
 0x14c   : > { %542 = shalt.err (!%p539_p12)
}
 0x14d   : > { %s543_s27 = scalar_lea.hbm %s684_s5, 16 }
 0x14e   : > { %p544_p13 = scmp.ne.s32.totalorder %s684_s5, %s543_s27  ;;  %p549_p2 = scmp.lt.u32.totalorder %s543_s27, %s684_s5 }
 0x150   : > { %p545_p0 = pnand %p544_p13, %p481_p6 }
 0x152   : > { %p546_p1 = pneg %p545_p0 }
 0x154   : > { %p551_p3 = pnand %p549_p2, %p546_p1 }
 0x156   : > { %554 = shalt.err (!%p551_p3)
}
 0x157   : > { %476 = dma.vmem_to_hbm [thread:$0]  (%p481_p6), %s385_s9, 16, %s684_s5, [#allocation7]  }
 0x158   : > { %560 = dma.done.wait (%p481_p6), [#allocation5], 16  }
 0x159   : > { %562 = vsyncadd (%p481_p6), [#allocation5], 4294967280 }
 0x15a   : > { %564 = dma.done.wait (%p481_p6), [#allocation7], 16  }
 0x15b   : > { %566 = vsyncadd (%p481_p6), [#allocation7], 4294967280 }
 0x15c PF: > { %s18_s18 = sadd.s32 1, %s569_s18  }
 0x15d   : > { %p15_p4 = scmp.ge.s32.totalorder %s18_s18, 5  }
 0x15f   :  { %17 = sbr.rel (!%p15_p4) target bundleno = 2 (0x2), region = 79 }
 0x166   :  { %401 = vsyncpa [#allocation5], 1 }
 0x167   :  { %403 = vsyncpa [#allocation5 + $0x1], 1 }
 0x168   :  { %404 = vsyncpa [#allocation7], 1 }

</bundles_post_ra>
